<compile_context>
chip_gen: v5e
topology: v5e:2x2
jax: 0.10.0
libtpu: 0.0.40
codegen_flags: <defaults>
</compile_context>

<pallas_src>
import jax
import jax.numpy as jnp
from jax.experimental import pallas as pl
from jax.experimental.pallas import tpu as pltpu

# ---- model hyper-params (small, consistent with the module's __init__) ----
B = 8              # batch
STATE_DIM = 32     # state_dim
HIDDEN = 64        # hidden_dim
HIDDEN_PAD = 128   # hidden padded to a full vreg lane width
TM = 256           # batch tile for the rollout-sized (gridded) path


def _round_up(n, m):
    return ((n + m - 1) // m) * m


def value_kernel(xT_ref, w1_ref, w2_ref, o_ref):
    """One batch tile of the ValueNet forward.

    xT_ref: (state_dim+1, TM) f32 -- states as columns; last row is all ones.
    w1_ref: (HIDDEN_PAD, state_dim+1) f32 -- fc1 weight in PyTorch (out,in)
            layout with fc1 bias as the last column, plus one "carrier" row
            whose pre-ReLU activation is exactly 1; remaining rows are zero.
    w2_ref: (HIDDEN_PAD, 1) f32 -- fc2 weight as a column; the carrier entry
            holds the fc2 bias; padded entries are zero.
    o_ref:  (1, TM) f32 -- lane-dense row of state values.
    """
    h = jnp.dot(w1_ref[...], xT_ref[...],
                preferred_element_type=jnp.float32,
                precision=jax.lax.Precision.HIGHEST)       # (HIDDEN_PAD, TM) MXU
    h = jnp.maximum(h, 0.0)                                 # ReLU (VPU)
    # Layer 2: N=1 MXU matmul replaced by VPU multiply + sublane reduce (XLU);
    # the fc2 bias rides along via the carrier row (h[carrier, :] == 1).
    v = jnp.sum(h * w2_ref[...], axis=0, keepdims=True)     # (1, TM)
    o_ref[...] = v.astype(o_ref.dtype)


def pack_params(params, hidden_pad=HIDDEN_PAD):
    """Fold both biases into padded, kernel-friendly weight layouts."""
    w1 = params["fc1_w"].astype(jnp.float32)   # (hidden, state_dim)
    b1 = params["fc1_b"].astype(jnp.float32)   # (hidden,)
    w2 = params["fc2_w"].astype(jnp.float32)   # (1, hidden)
    b2 = params["fc2_b"].astype(jnp.float32)   # (1,)
    hidden, state_dim = w1.shape
    assert hidden_pad >= hidden + 1, "need one spare row to carry the fc2 bias"
    carrier = hidden

    w1_big = jnp.zeros((hidden_pad, state_dim + 1), jnp.float32)
    w1_big = w1_big.at[:hidden, :state_dim].set(w1)
    w1_big = w1_big.at[:hidden, state_dim].set(b1)          # fc1 bias column
    w1_big = w1_big.at[carrier, state_dim].set(1.0)         # relu(1) == 1

    w2_col = jnp.zeros((hidden_pad, 1), jnp.float32)
    w2_col = w2_col.at[:hidden, 0].set(w2[0])
    w2_col = w2_col.at[carrier, 0].set(b2[0])                # fc2 bias carrier
    return w1_big, w2_col


def _augment_and_transpose(x, b_pad):
    """x (b, state_dim) -> (state_dim+1, b_pad) with a ones row appended."""
    b = x.shape[0]
    x_aug = jnp.concatenate(
        [x.astype(jnp.float32), jnp.ones((b, 1), jnp.float32)], axis=1)
    if b_pad > b:
        x_aug = jnp.concatenate(
            [x_aug, jnp.zeros((b_pad - b, x_aug.shape[1]), jnp.float32)], axis=0)
    return x_aug.T


def value_net_forward(x, params, *, tm=TM, hidden_pad=HIDDEN_PAD):
    """ValueNet forward: x (B, state_dim) f32 -> (B, 1) f32."""
    b, state_dim = x.shape
    k_aug = state_dim + 1
    w1_big, w2_col = pack_params(params, hidden_pad)

    cost = pl.CostEstimate(
        flops=2 * hidden_pad * k_aug * b + 3 * hidden_pad * b,
        transcendentals=0,
        bytes_accessed=4 * (k_aug * b + hidden_pad * k_aug + hidden_pad + b))

    if b <= tm:
        # Latency path (nominal small-batch evaluation): no grid => no per-step
        # pipeline prologue/epilogue, no double buffering, 3 tiny DMAs total.
        b_pad = max(_round_up(b, 8), 8)
        xT = _augment_and_transpose(x, b_pad)               # (k_aug, b_pad)
        vmem = pltpu.MemorySpace.VMEM
        out = pl.pallas_call(
            value_kernel,
            out_shape=jax.ShapeDtypeStruct((1, b_pad), jnp.float32),
            in_specs=[pl.BlockSpec(memory_space=vmem)] * 3,
            out_specs=pl.BlockSpec(memory_space=vmem),
            cost_estimate=cost,
        )(xT, w1_big, w2_col)
    else:
        # Rollout path: tile the batch, keep weights VMEM-resident (constant
        # index maps), lane-dense (1, b_pad) output, "parallel" batch axis so
        # v7x's two TensorCores split the grid (no effect on v5e/v6e).
        b_pad = _round_up(b, tm)
        xT = _augment_and_transpose(x, b_pad)               # (k_aug, b_pad)
        out = pl.pallas_call(
            value_kernel,
            out_shape=jax.ShapeDtypeStruct((1, b_pad), jnp.float32),
            grid=(b_pad // tm,),
            in_specs=[
                pl.BlockSpec((k_aug, tm), lambda i: (0, i)),
                pl.BlockSpec((hidden_pad, k_aug), lambda i: (0, 0)),
                pl.BlockSpec((hidden_pad, 1), lambda i: (0, 0)),
            ],
            out_specs=pl.BlockSpec((1, tm), lambda i: (0, i)),
            compiler_params=pltpu.CompilerParams(
                dimension_semantics=("parallel",)),
            cost_estimate=cost,
        )(xT, w1_big, w2_col)

    # Trim batch padding and restore the module's (B, 1) output shape.
    return out[0, :b].reshape(b, 1)


def value_net_reference(x, params):
    """Pure-JAX reference (same math as the PyTorch forward)."""
    h = jnp.maximum(
        jnp.dot(x, params["fc1_w"].T, precision=jax.lax.Precision.HIGHEST)
        + params["fc1_b"], 0.0)
    return (jnp.dot(h, params["fc2_w"].T, precision=jax.lax.Precision.HIGHEST)
            + params["fc2_b"])


def init_params(key):
    """Deterministic synthetic parameters matching the PyTorch module shapes."""
    k_w1, k_b1, k_w2, k_b2 = jax.random.split(key, 4)
    sc = 0.1
    return {
        "fc1_w": (sc * jax.random.normal(k_w1, (HIDDEN, STATE_DIM))).astype(jnp.float32),
        "fc1_b": (sc * jax.random.normal(k_b1, (HIDDEN,))).astype(jnp.float32),
        "fc2_w": (sc * jax.random.normal(k_w2, (1, HIDDEN))).astype(jnp.float32),
        "fc2_b": (sc * jax.random.normal(k_b2, (1,))).astype(jnp.float32),
    }


if __name__ == "__main__":
    key = jax.random.PRNGKey(0)
    k_p, k_x, k_xr = jax.random.split(key, 3)
    params = init_params(k_p)

    # Small-batch (gridless latency) path -- the module's nominal shapes.
    x = jax.random.normal(k_x, (B, STATE_DIM), dtype=jnp.float32)
    out = jax.block_until_ready(value_net_forward(x, params))
    ref = value_net_reference(x, params)
    assert out.shape == (B, 1)
    assert bool(jnp.all(jnp.isfinite(out)))
    assert bool(jnp.allclose(out, ref, atol=1e-5, rtol=1e-5))

    # Rollout-sized (gridded, resident-weight, lane-dense) path.
    xr = jax.random.normal(k_xr, (300, STATE_DIM), dtype=jnp.float32)
    outr = jax.block_until_ready(value_net_forward(xr, params))
    refr = value_net_reference(xr, params)
    assert outr.shape == (300, 1)
    assert bool(jnp.allclose(outr, refr, atol=1e-5, rtol=1e-5))

    print("KERNEL_OK")
</pallas_src>

<mosaic_0001>
module attributes {stable_mosaic.version = 11 : i64} {
  func.func @value_kernel(%arg0: memref<33x8xf32, #tpu.memory_space<vmem>>, %arg1: memref<128x33xf32, #tpu.memory_space<vmem>>, %arg2: memref<128x1xf32, #tpu.memory_space<vmem>>, %arg3: memref<1x8xf32, #tpu.memory_space<vmem>>) attributes {dimension_semantics = [], scalar_prefetch = 0 : i64, scratch_operands = 0 : i64, tpu.core_type = #tpu.core_type<tc>} {
    %c0 = arith.constant 0 : index
    %c0_0 = arith.constant 0 : index
    %0 = vector.load %arg1[%c0, %c0_0] : memref<128x33xf32, #tpu.memory_space<vmem>>, vector<128x33xf32>
    %c0_1 = arith.constant 0 : index
    %c0_2 = arith.constant 0 : index
    %1 = vector.load %arg0[%c0_1, %c0_2] : memref<33x8xf32, #tpu.memory_space<vmem>>, vector<33x8xf32>
    %cst = arith.constant dense<0.000000e+00> : vector<128x8xf32>
    %2 = tpu.matmul %0, %1, %cst {dimension_numbers = #tpu.dot_dimension_numbers<[1], [0], [0], [1], [0, 0, 1, 1], [], []>, precision = #tpu.contract_precision<fp32>} : vector<128x33xf32>, vector<33x8xf32>, vector<128x8xf32> -> vector<128x8xf32>
    %cst_3 = arith.constant 0.000000e+00 : f32
    %3 = vector.broadcast %cst_3 : f32 to vector<128x8xf32>
    %4 = arith.maximumf %2, %3 : vector<128x8xf32>
    %c0_4 = arith.constant 0 : index
    %c0_5 = arith.constant 0 : index
    %5 = vector.load %arg2[%c0_4, %c0_5] : memref<128x1xf32, #tpu.memory_space<vmem>>, vector<128x1xf32>
    %6 = vector.broadcast %5 : vector<128x1xf32> to vector<128x8xf32>
    %7 = arith.mulf %4, %6 : vector<128x8xf32>
    %cst_6 = arith.constant dense<0.000000e+00> : vector<8xf32>
    %8 = vector.multi_reduction <add>, %7, %cst_6 [0] : vector<128x8xf32> to vector<8xf32>
    %9 = vector.shape_cast %8 : vector<8xf32> to vector<1x8xf32>
    %c0_7 = arith.constant 0 : index
    %c0_8 = arith.constant 0 : index
    %10 = vector.load %arg3[%c0_7, %c0_8] : memref<1x8xf32, #tpu.memory_space<vmem>>, vector<1x8xf32>
    tpu.vector_store %arg3[%c0_7, %c0_8], %9 {strides = array<i32>} : memref<1x8xf32, #tpu.memory_space<vmem>>, vector<1x8xf32>,
    return
  }
}

</mosaic_0001>

<bundles_post_ra>
// kernel: tpu_custom_call.1
= control target key start
LH: loop header
LB: loop body
LE: loop exit
PB: predicated region body
PF: predicated region fallthrough
CT: control target
= control target key end

     0   :  { %vm85_vm0 = vcmask 1040384   ;;  %vm36_vm1 = vcmask 269312   ;;  %s1505_s0 = inlined_call_operand.vmem [shape: f32[33,8], index: 0, kind: input, shape index: {}]   ;;  %s1506_s1 = inlined_call_operand.vmem [shape: f32[128,33], index: 1, kind: input, shape index: {}]   ;;  %s1507_s2 = inlined_call_operand.vmem [shape: f32[128,1], index: 2, kind: input, shape index: {}]   ;;  %s1508_s3 = inlined_call_operand.hbm [shape: f32[1,8], index: 3, kind: output, shape index: {}]  }
   0x1   :  { %v35_v0 = vld [vmem:[%s1505_s0 + $0x20] sm:$0x1]  ;;  %v34_v1 = vld [vmem:[%s1505_s0 + $0x18] sm:$0xff]  ;;  %v33_v2 = vld [vmem:[%s1505_s0 + $0x10] sm:$0xff] }
   0x2   :  { %v87_v3 = vsel %vm85_vm0, %v35_v0, 0  ;;  %v1008_v4 = vand.u32 4294901760, %v34_v1  ;;  %v1010_v5 = vand.u32 4294901760, %v33_v2  ;;  %v32_v6 = vld [vmem:[%s1505_s0 + $0x8] sm:$0xff]  ;;  %v31_v7 = vld [vmem:[%s1505_s0] sm:$0xff] }
   0x3   :  { %v23_v8 = vld [vmem:[%s1506_s1 + $0x40] sm:$0xff]  ;;  %v1021_v9 = vand.u32 4294901760, %v87_v3  ;;  %v1023_v10 = vand.u32 4294901760, %v32_v6  ;;  %v1025_v11 = vand.u32 4294901760, %v31_v7  ;;  %v24_v13 = vld [vmem:[%s1506_s1 + $0x48] sm:$0xff] }
   0x4   :  { %v62_v12 = vsel %vm36_vm1, %v23_v8, 0  ;;  %v15_v14 = vld [vmem:[%s1506_s1] sm:$0xff]  ;;  %v1037_v16 = vsub.f32 %v34_v1, %v1008_v4  ;;  %v1040_v17 = vsub.f32 %v33_v2, %v1010_v5  ;;  %v65_v18 = vsel %vm36_vm1, %v24_v13, 0 }
   0x5   :  { %v1034_v15 = vand.u32 4294901760, %v62_v12  ;;  %936 = vmatpush.msra.mxu2 %v1021_v9  ;;  %v1045_v19 = vsub.f32 %v87_v3, %v1021_v9  ;;  %v1048_v20 = vsub.f32 %v32_v6, %v1023_v10  ;;  %101 = vmatpush.msra.mxu0 %v1021_v9  ;;  %v1052_v21 = vsub.f32 %v31_v7, %v1025_v11 }
   0x6   :  { %v1054_v22 = vand.u32 4294901760, %v65_v18 }
   0x7   :  { %8 = vsyncpa [#allocation3], 0  ;;  %v1057_v23 = vsub.f32 %v62_v12, %v1034_v15  ;;  %v258_v24 = vand.u32 4294901760, %v1037_v16  ;;  %v264_v25 = vand.u32 4294901760, %v1040_v17  ;;  %v38_v26 = vsel %vm36_vm1, %v15_v14, 0  ;;  %937 = vmatpush.msra.mxu2 %v1008_v4  ;;  %103 = vmatpush.msra.mxu0 %v1008_v4  ;;  %v25_v36 = vld [vmem:[%s1506_s1 + $0x50] sm:$0xff] }
   0x8   :  { %v252_v27 = vand.u32 4294901760, %v1045_v19  ;;  %v270_v28 = vand.u32 4294901760, %v1048_v20  ;;  %v1066_v29 = vsub.f32 %v65_v18, %v1054_v22  ;;  %v1073_v32 = vand.u32 4294901760, %v38_v26  ;;  %v16_v37 = vld [vmem:[%s1506_s1 + $0x8] sm:$0xff]  ;;  %v26_v44 = vld [vmem:[%s1506_s1 + $0x58] sm:$0xff]  ;;  %v17_v45 = vld [vmem:[%s1506_s1 + $0x10] sm:$0xff] }
   0x9   :  { %v176_v30 = vand.u32 4294901760, %v1057_v23  ;;  %v259_v31 = vsub.f32 %v1037_v16, %v258_v24  ;;  %938 = vmatpush.msra.mxu2 %v1010_v5  ;;  %v265_v34 = vsub.f32 %v1040_v17, %v264_v25  ;;  %v276_v35 = vand.u32 4294901760, %v1052_v21  ;;  %105 = vmatpush.msra.mxu0 %v1010_v5  ;;  %v18_v63 = vld [vmem:[%s1506_s1 + $0x18] sm:$0xff]  ;;  %v27_v8 = vld [vmem:[%s1506_s1 + $0x60] sm:$0xff]  ;;  %s927_s30 = sshll.u32 %s1508_s3, 4  ;;  %s928_s30 = int_to_ptr.hbm [resolvable:$true] %s927_s30 }
   0xa   :  { %v253_v33 = vsub.f32 %v1045_v19, %v252_v27  ;;  %v184_v39 = vand.u32 4294901760, %v1066_v29  ;;  %v1093_v40 = vsub.f32 %v38_v26, %v1073_v32  ;;  %v271_v43 = vsub.f32 %v1048_v20, %v270_v28 }
   0xb   :  { %v177_v38 = vsub.f32 %v1057_v23, %v176_v30  ;;  %939 = vmatpush.msra.mxu2 %v1023_v10  ;;  %v260_v42 = vand.u32 4294901760, %v259_v31  ;;  %107 = vmatpush.msra.mxu0 %v1023_v10  ;;  %v68_v48 = vsel %vm36_vm1, %v25_v36, 0  ;;  %v41_v49 = vsel %vm36_vm1, %v16_v37, 0 }
   0xc   :  { %v254_v41 = vand.u32 4294901760, %v253_v33  ;;  %v112_v47 = vand.u32 4294901760, %v1093_v40  ;;  %v266_v50 = vand.u32 4294901760, %v265_v34  ;;  %v277_v51 = vsub.f32 %v1052_v21, %v276_v35 }
   0xd   :  { %v178_v46 = vand.u32 4294901760, %v177_v38  ;;  %940 = vmatpush.msra.mxu2 %v1025_v11  ;;  %v1113_v52 = vand.u32 4294901760, %v68_v48  ;;  %v1115_v53 = vand.u32 4294901760, %v41_v49  ;;  %v185_v54 = vsub.f32 %v1066_v29, %v184_v39  ;;  %109 = vmatpush.msra.mxu0 %v1025_v11 }
   0xe   :  { %941 = vmatpush.msra.mxu3 %v254_v41  ;;  %255 = vmatpush.msra.mxu1 %v254_v41  ;;  %v113_v55 = vsub.f32 %v1093_v40, %v112_v47  ;;  %v71_v56 = vsel %vm36_vm1, %v26_v44, 0  ;;  %v44_v57 = vsel %vm36_vm1, %v17_v45, 0  ;;  %v272_v58 = vand.u32 4294901760, %v271_v43 }
   0xf   :  { %179 = vmatmul.f32.vlgmr.msra.gmra.mxu2 %v178_v46  ;;  %v1127_v59 = vsub.f32 %v68_v48, %v1113_v52  ;;  %v1130_v60 = vsub.f32 %v41_v49, %v1115_v53  ;;  %v1132_v61 = vand.u32 4294901760, %v44_v57  ;;  %v278_v0 = vand.u32 4294901760, %v277_v51  ;;  %584 = vmatpush.msrb.mxu0 %v252_v27 }
  0x10   :  { %942 = vmatpush.msra.mxu3 %v260_v42  ;;  %358 = vmatpush.msrb.mxu2 %v1045_v19  ;;  %v114_v62 = vand.u32 4294901760, %v113_v55  ;;  %v1139_v2 = vand.u32 4294901760, %v71_v56  ;;  %v186_v3 = vand.u32 4294901760, %v185_v54  ;;  %v47_v13 = vsel %vm36_vm1, %v18_v63, 0  ;;  %v21_v54 = vld [vmem:[%s1506_s1 + $0x30] sm:$0xff] }
  0x11   :  { %261 = vmatpush.msra.mxu1 %v260_v42  ;;  %v120_v1 = vand.u32 4294901760, %v1130_v60  ;;  %v192_v6 = vand.u32 4294901760, %v1127_v59  ;;  %v1143_v7 = vsub.f32 %v44_v57, %v1132_v61  ;;  %588 = vmatpush.msrb.mxu0 %v258_v24  ;;  %v74_v18 = vsel %vm36_vm1, %v27_v8, 0  ;;  %v19_v24 = vld [vmem:[%s1506_s1 + $0x20] sm:$0xff] }
  0x12   :  { %943 = vmatpush.msra.mxu3 %v266_v50  ;;  %115 = vmatmul.f32.vlgmr.msra.gmra.mxu0 %v114_v62  ;;  %v1156_v14 = vsub.f32 %v71_v56, %v1139_v2  ;;  %v1176_v31 = vand.u32 4294901760, %v74_v18  ;;  %v56_v63 = vsel %vm36_vm1, %v21_v54, 0  ;;  %vm880_vm2 = vcmask 64512  }
  0x13   :  { %267 = vmatpush.msra.mxu1 %v266_v50  ;;  %361 = vmatpush.msrb.mxu2 %v1037_v16  ;;  %v121_v12 = vsub.f32 %v1130_v60, %v120_v1  ;;  %v193_v19 = vsub.f32 %v1127_v59, %v192_v6  ;;  %v128_v27 = vand.u32 4294901760, %v1143_v7  ;;  %v1165_v16 = vand.u32 4294901760, %v47_v13 }
  0x14   :  { %944 = vmatpush.msra.mxu3 %v272_v58  ;;  %592 = vmatpush.msrb.mxu0 %v264_v25  ;;  %v200_v34 = vand.u32 4294901760, %v1156_v14  ;;  %v28_v25 = vld [vmem:[%s1506_s1 + $0x68] sm:$0xff]  ;;  %v1196_v37 = vsub.f32 %v74_v18, %v1176_v31  ;;  %v1266_v18 = vand.u32 4294901760, %v56_v63  ;;  %vm918_vm3 = vcmask 57344  }
  0x15   :  { %273 = vmatpush.msra.mxu1 %v272_v58  ;;  %364 = vmatpush.msrb.mxu2 %v1040_v17  ;;  %v122_v26 = vand.u32 4294901760, %v121_v12  ;;  %v194_v33 = vand.u32 4294901760, %v193_v19  ;;  %v129_v36 = vsub.f32 %v1143_v7, %v128_v27  ;;  %v1183_v17 = vsub.f32 %v47_v13, %v1165_v16 }
  0x16   :  { %945 = vmatpush.msra.mxu3 %v278_v0  ;;  %596 = vmatpush.msrb.mxu0 %v270_v28  ;;  %v77_v38 = vsel %vm36_vm1, %v28_v25, 0  ;;  %v208_v42 = vand.u32 4294901760, %v1196_v37 }
  0x17   :  { %187 = vmatmul.f32.gmra.mxu2 %v186_v3  ;;  %313 = vmatmul.f32.vlgmr.msra.gmra.mxu3 %v1034_v15  ;;  %v136_v28 = vand.u32 4294901760, %v1183_v17  ;;  %v1217_v43 = vand.u32 4294901760, %v77_v38 }
  0x18   :  { %464 = vmatpush.msrb.mxu3 %v1021_v9  ;;  %279 = vmatpush.msra.mxu1 %v278_v0  ;;  %v209_v46 = vsub.f32 %v1196_v37, %v208_v42  ;;  %v30_v0 = vld [vmem:[%s1506_s1 + $0x78] sm:$0xff] }
  0x19   :  { %281 = vmatmul.f32.vlgmr.msra.gmra.mxu1 %v1073_v32  ;;  %367 = vmatpush.msrb.mxu2 %v1048_v20  ;;  %v130_v20 = vand.u32 4294901760, %v129_v36  ;;  %v83_v19 = vsel %vm36_vm1, %v30_v0, 0 }
  0x1a   :  { %678 = vmatpush.msrb.mxu1 %v1021_v9  ;;  %466 = vmatpush.msrb.mxu3 %v1008_v4  ;;  %v50_v9 = vsel %vm36_vm1, %v19_v24, 0  ;;  %v210_v56 = vand.u32 4294901760, %v209_v46  ;;  %v1277_v25 = vand.u32 4294901760, %v83_v19 }
  0x1b   :  { %123 = vmatmul.f32.gmra.mxu0 %v122_v26  ;;  %370 = vmatpush.msrb.mxu2 %v1052_v21  ;;  %v1206_v41 = vand.u32 4294901760, %v50_v9  ;;  %v29_v21 = vld [vmem:[%s1506_s1 + $0x70] sm:$0xff]  ;;  %v22_v26 = vld [vmem:[%s1506_s1 + $0x38] sm:$0xff] }
  0x1c   :  { %680 = vmatpush.msrb.mxu1 %v1008_v4  ;;  %468 = vmatpush.msrb.mxu3 %v1010_v5  ;;  %v201_v4 = vsub.f32 %v1156_v14, %v200_v34  ;;  %v80_v50 = vsel %vm36_vm1, %v29_v21, 0 }
  0x1d   :  { %600 = vmatpush.msrb.mxu0 %v276_v35  ;;  %v1224_v45 = vsub.f32 %v50_v9, %v1206_v41  ;;  %v1245_v55 = vand.u32 4294901760, %v80_v50  ;;  %v1280_v9 = vsub.f32 %v56_v63, %v1266_v18 }
  0x1e   :  { %682 = vmatpush.msrb.mxu1 %v1010_v5  ;;  %470 = vmatpush.msrb.mxu3 %v1023_v10  ;;  %v20_v5 = vld [vmem:[%s1506_s1 + $0x28] sm:$0xff]  ;;  %v202_v44 = vand.u32 4294901760, %v201_v4 }
  0x1f   :  { %195 = vmatmul.f32.gmra.mxu2 %v194_v33  ;;  %317 = vmatmul.f32.gmra.mxu3 %v1054_v22  ;;  %v53_v35 = vsel %vm36_vm1, %v20_v5, 0  ;;  %v144_v49 = vand.u32 4294901760, %v1224_v45  ;;  %v1259_v3 = vsub.f32 %v80_v50, %v1245_v55  ;;  %v1288_v5 = vsub.f32 %v83_v19, %v1277_v25  ;;  %v769_v19 = vld [vmem:[%s1507_s2 + $0x8] sm:$0xff] }
  0x20   :  { %684 = vmatpush.msrb.mxu1 %v1023_v10  ;;  %472 = vmatpush.msrb.mxu3 %v1025_v11  ;;  %v137_v10 = vsub.f32 %v1183_v17, %v136_v28  ;;  %v1239_v51 = vand.u32 4294901760, %v53_v35 }
  0x21   :  { %285 = vmatmul.f32.gmra.mxu1 %v1115_v53  ;;  %v145_v58 = vsub.f32 %v1224_v45, %v144_v49  ;;  %v224_v24 = vand.u32 4294901760, %v1259_v3 }
  0x22   :  { %686 = vmatpush.msrb.mxu1 %v1025_v11  ;;  %v1234_v11 = vsub.f32 %v77_v38, %v1217_v43  ;;  %v138_v48 = vand.u32 4294901760, %v137_v10  ;;  %v1252_v62 = vsub.f32 %v53_v35, %v1239_v51  ;;  %v59_v38 = vsel %vm36_vm1, %v22_v26, 0  ;;  %v770_v26 = vld [vmem:[%s1507_s2 + $0x10] sm:$0xff] }
  0x23   :  { %131 = vmatmul.f32.gmra.mxu0 %v130_v20  ;;  %v146_v12 = vand.u32 4294901760, %v145_v58  ;;  %v225_v4 = vsub.f32 %v1259_v3, %v224_v24  ;;  %v1291_v10 = vand.u32 4294901760, %v59_v38  ;;  %v232_v35 = vand.u32 4294901760, %v1288_v5 }
  0x24   :  { %v216_v57 = vand.u32 4294901760, %v1234_v11  ;;  %v152_v13 = vand.u32 4294901760, %v1252_v62 }
  0x25   :  { %v226_v21 = vand.u32 4294901760, %v225_v4  ;;  %v233_v50 = vsub.f32 %v1288_v5, %v232_v35 }
  0x26   :  { %v217_v8 = vsub.f32 %v1234_v11, %v216_v57  ;;  %v153_v36 = vsub.f32 %v1252_v62, %v152_v13 }
  0x27   :  { %203 = vmatmul.f32.gmra.mxu2 %v202_v44  ;;  %321 = vmatmul.f32.gmra.mxu3 %v1113_v52  ;;  %v160_v44 = vand.u32 4294901760, %v1280_v9  ;;  %v234_v58 = vand.u32 4294901760, %v233_v50 }
  0x28   :  { %v218_v33 = vand.u32 4294901760, %v217_v8  ;;  %v154_v20 = vand.u32 4294901760, %v153_v36  ;;  %v977_v8 = vmov 0  }
  0x29   :  { %289 = vmatmul.f32.gmra.mxu1 %v1132_v61  ;;  %v161_v46 = vsub.f32 %v1280_v9, %v160_v44  ;;  %948 = vset.pattern.permute.xlu0 %v977_v8 }
  0x2a   :  { %949 = vset.pattern.permute.xlu1 %v977_v8  ;;  %950 = vset.pattern.permute.xlu2 %v977_v8 }
  0x2b   :  { %139 = vmatmul.f32.gmra.mxu0 %v138_v48  ;;  %v1299_v48 = vsub.f32 %v59_v38, %v1291_v10  ;;  %v162_v54 = vand.u32 4294901760, %v161_v46  ;;  %796 = vperm.xlu1 %949, %v770_v26   ;;  %v779_v46 = vld [vmem:[%s1507_s2 + $0x58] sm:$0xff] }
  0x2f   :  { %211 = vmatmul.f32.gmra.mxu2 %v210_v56  ;;  %325 = vmatmul.f32.gmra.mxu3 %v1139_v2  ;;  %v168_v56 = vand.u32 4294901760, %v1299_v48 }
  0x31   :  { %293 = vmatmul.f32.gmra.mxu1 %v1165_v16  ;;  %v169_v63 = vsub.f32 %v1299_v48, %v168_v56 }
  0x33   :  { %147 = vmatmul.f32.gmra.mxu0 %v146_v12  ;;  %v170_v0 = vand.u32 4294901760, %v169_v63  ;;  %v768_v12 = vld [vmem:[%s1507_s2] sm:$0xff] }
  0x34   :  { %786 = vperm.xlu0 %948, %v768_v12  }
  0x37   :  { %219 = vmatmul.f32.gmra.mxu2 %v218_v33  ;;  %329 = vmatmul.f32.gmra.mxu3 %v1176_v31 }
  0x39   :  { %297 = vmatmul.f32.gmra.mxu1 %v1206_v41 }
  0x3b   :  { %155 = vmatmul.f32.gmra.mxu0 %v154_v20 }
  0x3c   :  { %791 = vperm.xlu0 %948, %v769_v19  }
  0x3f   :  { %227 = vmatmul.f32.gmra.mxu2 %v226_v21  ;;  %333 = vmatmul.f32.gmra.mxu3 %v1217_v43 }
  0x41   :  { %301 = vmatmul.f32.gmra.mxu1 %v1239_v51 }
  0x43   :  { %163 = vmatmul.f32.gmra.mxu0 %v162_v54 }
  0x47   :  { %235 = vmatmul.f32.gmra.mxu2 %v234_v58  ;;  %337 = vmatmul.f32.gmra.mxu3 %v1245_v55 }
  0x49   :  { %305 = vmatmul.f32.gmra.mxu1 %v1266_v18 }
  0x4b   :  { %171 = vmatmul.f32.gmra.mxu0 %v170_v0 }
  0x4f   :  { %341 = vmatmul.f32.gmra.mxu3 %v1277_v25  ;;  %373 = vmatmul.f32.vlgmr.msrb.gmra.mxu2 %v1093_v40  ;;  %v774_v40 = vld [vmem:[%s1507_s2 + $0x30] sm:$0xff] }
  0x50   :  { %816 = vperm.xlu0 %948, %v774_v40  }
  0x51   :  { %309 = vmatmul.f32.gmra.mxu1 %v1291_v10 }
  0x53   :  { %602 = vmatmul.f32.vlgmr.msrb.gmra.mxu0 %v1073_v32 }
  0x57   :  { %378 = vmatmul.f32.gmra.mxu2 %v1130_v60  ;;  %476 = vmatmul.f32.vlgmr.msrb.gmra.mxu3 %v112_v47  ;;  %v772_v47 = vld [vmem:[%s1507_s2 + $0x20] sm:$0xff]  ;;  %v773_v60 = vld [vmem:[%s1507_s2 + $0x28] sm:$0xff] }
  0x58   :  { %806 = vperm.xlu2 %950, %v772_v47  }
  0x59   :  { %688 = vmatmul.f32.vlgmr.msrb.gmra.mxu1 %v1073_v32  ;;  %v771_v32 = vld [vmem:[%s1507_s2 + $0x18] sm:$0xff] }
  0x5a   :  { %801 = vperm.xlu1 %949, %v771_v32  }
  0x5b   :  { %606 = vmatmul.f32.gmra.mxu0 %v1115_v53 }
  0x5f   :  { %383 = vmatmul.f32.gmra.mxu2 %v1143_v7  ;;  %482 = vmatmul.f32.gmra.mxu3 %v120_v1 }
  0x60   :  { %811 = vperm.xlu2 %950, %v773_v60  }
  0x61   :  { %692 = vmatmul.f32.gmra.mxu1 %v1115_v53  ;;  %v775_v53 = vld [vmem:[%s1507_s2 + $0x38] sm:$0xff] }
  0x62   :  { %821 = vperm.xlu1 %949, %v775_v53  }
  0x63   :  { %610 = vmatmul.f32.gmra.mxu0 %v1132_v61 }
  0x67   :  { %388 = vmatmul.f32.gmra.mxu2 %v1183_v17  ;;  %488 = vmatmul.f32.gmra.mxu3 %v128_v27  ;;  %v780_v17 = vld [vmem:[%s1507_s2 + $0x60] sm:$0xff] }
  0x69   :  { %696 = vmatmul.f32.gmra.mxu1 %v1132_v61  ;;  %v777_v61 = vld [vmem:[%s1507_s2 + $0x48] sm:$0xff] }
  0x6a   :  { %831 = vperm.xlu0 %948, %v777_v61  }
  0x6b   :  { %614 = vmatmul.f32.gmra.mxu0 %v1165_v16 }
  0x6f   :  { %393 = vmatmul.f32.gmra.mxu2 %v1224_v45  ;;  %494 = vmatmul.f32.gmra.mxu3 %v136_v28 }
  0x71   :  { %700 = vmatmul.f32.gmra.mxu1 %v1165_v16 }
  0x72   :  { %846 = vperm.xlu0 %948, %v780_v17  }
  0x73   :  { %618 = vmatmul.f32.gmra.mxu0 %v1206_v41 }
  0x77   :  { %398 = vmatmul.f32.gmra.mxu2 %v1252_v62  ;;  %500 = vmatmul.f32.gmra.mxu3 %v144_v49 }
  0x79   :  { %704 = vmatmul.f32.gmra.mxu1 %v1206_v41 }
  0x7b   :  { %622 = vmatmul.f32.gmra.mxu0 %v1239_v51 }
  0x7f   :  { %403 = vmatmul.f32.gmra.mxu2 %v1280_v9  ;;  %506 = vmatmul.f32.gmra.mxu3 %v152_v13 }
  0x81   :  { %708 = vmatmul.f32.gmra.mxu1 %v1239_v51 }
  0x83   :  { %626 = vmatmul.f32.gmra.mxu0 %v1266_v18 }
  0x87   :  { %408 = vmatmul.f32.gmra.mxu2 %v1299_v48  ;;  %512 = vmatmul.f32.gmra.mxu3 %v160_v44 }
  0x89   :  { %712 = vmatmul.f32.gmra.mxu1 %v1266_v18 }
  0x8b   :  { %630 = vmatmul.f32.gmra.mxu0 %v1291_v10 }
  0x8f   :  { %413 = vmatmul.f32.gmra.mxu2 %v1057_v23  ;;  %518 = vmatmul.f32.gmra.mxu3 %v168_v56  ;;  %v116_v1 = vpop.f32.mrf.mxu0  ;;  %v778_v23 = vld [vmem:[%s1507_s2 + $0x50] sm:$0xff] }
  0x90   :  { %836 = vperm.xlu1 %949, %v778_v23   ;;  %v782_v56 = vld [vmem:[%s1507_s2 + $0x70] sm:$0xff] }
  0x91   :  { %716 = vmatmul.f32.gmra.mxu1 %v1291_v10 }
  0x92   :  { %v180_v7 = vpop.f32.mrf.mxu2 }
  0x93   :  { %634 = vmatmul.f32.gmra.mxu0 %v1034_v15 }
  0x96   :  { %v282_v27 = vpop.f32.mrf.mxu1 }
  0x97   :  { %418 = vmatmul.f32.gmra.mxu2 %v1066_v29  ;;  %524 = vmatmul.f32.gmra.mxu3 %v176_v30  ;;  %v1382_v16 = vadd.f32 %v282_v27, %v116_v1  ;;  %v781_v29 = vld [vmem:[%s1507_s2 + $0x68] sm:$0xff] }
  0x98   :  { %v124_v28 = vpop.f32.mrf.mxu0  ;;  %851 = vperm.xlu1 %949, %v781_v29  }
  0x99   :  { %720 = vmatmul.f32.gmra.mxu1 %v1034_v15  ;;  %v783_v15 = vld [vmem:[%s1507_s2 + $0x78] sm:$0xff] }
  0x9a   :  { %v188_v41 = vpop.f32.mrf.mxu2  ;;  %v314_v45 = vpop.f32.mrf.mxu3  ;;  %861 = vperm.xlu0 %948, %v783_v15  }
  0x9b   :  { %v1388_v49 = vadd.f32 %v314_v45, %v180_v7  ;;  %638 = vmatmul.f32.gmra.mxu0 %v1054_v22 }
  0x9e   :  { %v286_v30 = vpop.f32.mrf.mxu1 }
  0x9f   :  { %423 = vmatmul.f32.gmra.mxu2 %v1127_v59  ;;  %530 = vmatmul.f32.gmra.mxu3 %v184_v39  ;;  %v1397_v51 = vadd.f32 %v286_v30, %v124_v28 }
  0xa0   :  { %v132_v62 = vpop.f32.mrf.mxu0 }
  0xa1   :  { %724 = vmatmul.f32.gmra.mxu1 %v1054_v22  ;;  %v776_v22 = vld [vmem:[%s1507_s2 + $0x40] sm:$0xff]  ;;  %s978_s2 = smov [#allocation2]  }
  0xa2   :  { %v196_v13 = vpop.f32.mrf.mxu2  ;;  %v318_v18 = vpop.f32.mrf.mxu3  ;;  %826 = vperm.xlu2 %950, %v776_v22   ;;  %s925_s0 = sshll.u32 %s978_s2, 4  ;;  %s926_s0 = int_to_ptr.vmem [resolvable:$true] %s925_s0 }
  0xa3   :  { %v1403_v33 = vadd.f32 %v318_v18, %v188_v41  ;;  %642 = vmatmul.f32.gmra.mxu0 %v1113_v52 }
  0xa6   :  { %v290_v39 = vpop.f32.mrf.mxu1 }
  0xa7   :  { %428 = vmatmul.f32.gmra.mxu2 %v1156_v14  ;;  %536 = vmatmul.f32.gmra.mxu3 %v192_v6  ;;  %v1412_v36 = vadd.f32 %v290_v39, %v132_v62 }
  0xa8   :  { %v140_v9 = vpop.f32.mrf.mxu0 }
  0xa9   :  { %728 = vmatmul.f32.gmra.mxu1 %v1113_v52 }
  0xaa   :  { %v204_v38 = vpop.f32.mrf.mxu2  ;;  %v322_v4 = vpop.f32.mrf.mxu3  ;;  %841 = vperm.xlu2 %950, %v779_v46  }
  0xab   :  { %v1418_v20 = vadd.f32 %v322_v4, %v196_v13  ;;  %646 = vmatmul.f32.gmra.mxu0 %v1139_v2  ;;  %v797_v46 = vpop.permute.xlu1 %796 }
  0xae   :  { %v294_v44 = vpop.f32.mrf.mxu1 }
  0xaf   :  { %433 = vmatmul.f32.gmra.mxu2 %v1196_v37  ;;  %542 = vmatmul.f32.gmra.mxu3 %v200_v34  ;;  %v1424_v59 = vadd.f32 %v294_v44, %v140_v9 }
  0xb0   :  { %v148_v6 = vpop.f32.mrf.mxu0 }
  0xb1   :  { %732 = vmatmul.f32.gmra.mxu1 %v1139_v2 }
  0xb2   :  { %v212_v10 = vpop.f32.mrf.mxu2  ;;  %v326_v21 = vpop.f32.mrf.mxu3  ;;  %856 = vperm.xlu2 %950, %v782_v56  }
  0xb3   :  { %v1427_v52 = vadd.f32 %v326_v21, %v204_v38  ;;  %650 = vmatmul.f32.gmra.mxu0 %v1176_v31 }
  0xb6   :  { %v298_v48 = vpop.f32.mrf.mxu1 }
  0xb7   :  { %438 = vmatmul.f32.gmra.mxu2 %v1234_v11  ;;  %548 = vmatmul.f32.gmra.mxu3 %v208_v42  ;;  %v1436_v14 = vadd.f32 %v298_v48, %v148_v6 }
  0xb8   :  { %v156_v2 = vpop.f32.mrf.mxu0 }
  0xb9   :  { %736 = vmatmul.f32.gmra.mxu1 %v1176_v31 }
  0xba   :  { %v220_v34 = vpop.f32.mrf.mxu2  ;;  %v330_v50 = vpop.f32.mrf.mxu3 }
  0xbb   :  { %v1439_v54 = vadd.f32 %v330_v50, %v212_v10  ;;  %654 = vmatmul.f32.gmra.mxu0 %v1217_v43 }
  0xbe   :  { %v302_v58 = vpop.f32.mrf.mxu1 }
  0xbf   :  { %443 = vmatmul.f32.gmra.mxu2 %v1259_v3  ;;  %554 = vmatmul.f32.gmra.mxu3 %v216_v57  ;;  %v1448_v37 = vadd.f32 %v302_v58, %v156_v2 }
  0xc0   :  { %v164_v31 = vpop.f32.mrf.mxu0 }
  0xc1   :  { %740 = vmatmul.f32.gmra.mxu1 %v1217_v43 }
  0xc2   :  { %v228_v42 = vpop.f32.mrf.mxu2  ;;  %v334_v63 = vpop.f32.mrf.mxu3 }
  0xc3   :  { %v1451_v0 = vadd.f32 %v334_v63, %v220_v34  ;;  %658 = vmatmul.f32.gmra.mxu0 %v1245_v55 }
  0xc6   :  { %v306_v8 = vpop.f32.mrf.mxu1 }
  0xc7   :  { %448 = vmatmul.f32.gmra.mxu2 %v1288_v5  ;;  %560 = vmatmul.f32.gmra.mxu3 %v224_v24  ;;  %v1457_v12 = vadd.f32 %v306_v8, %v164_v31 }
  0xc8   :  { %v172_v11 = vpop.f32.mrf.mxu0 }
  0xc9   :  { %744 = vmatmul.f32.gmra.mxu1 %v1245_v55 }
  0xca   :  { %v236_v57 = vpop.f32.mrf.mxu2  ;;  %v338_v19 = vpop.f32.mrf.mxu3 }
  0xcb   :  { %v1460_v43 = vadd.f32 %v338_v19, %v228_v42  ;;  %662 = vmatmul.f32.gmra.mxu0 %v1277_v25 }
  0xce   :  { %v310_v26 = vpop.f32.mrf.mxu1 }
  0xcf   :  { %566 = vmatmul.f32.gmra.mxu3 %v232_v35  ;;  %v1465_v32 = vadd.f32 %v310_v26, %v172_v11  ;;  %v787_v35 = vpop.permute.xlu0 %786  ;;  %v802_v26 = vpop.permute.xlu1 %801 }
  0xd0   :  { %v603_v40 = vpop.f32.mrf.mxu0 }
  0xd1   :  { %748 = vmatmul.f32.gmra.mxu1 %v1277_v25 }
  0xd2   :  { %v342_v3 = vpop.f32.mrf.mxu3  ;;  %v374_v24 = vpop.f32.mrf.mxu2 }
  0xd3   :  { %v1468_v47 = vadd.f32 %v342_v3, %v236_v57  ;;  %v375_v55 = vadd.f32 %v374_v24, %v1382_v16 }
  0xd6   :  { %v689_v53 = vpop.f32.mrf.mxu1 }
  0xd7   :  { %v792_v18 = vpop.permute.xlu0 %791 }
  0xd8   :  { %v607_v60 = vpop.f32.mrf.mxu0 }
  0xda   :  { %v379_v61 = vpop.f32.mrf.mxu2  ;;  %v477_v1 = vpop.f32.mrf.mxu3 }
  0xdb   :  { %v380_v7 = vadd.f32 %v379_v61, %v1397_v51  ;;  %v478_v27 = vadd.f32 %v477_v1, %v375_v55 }
  0xdd   :  { %v604_v5 = vadd.f32 %v603_v40, %v478_v27  ;;  %v807_v27 = vpop.permute.xlu2 %806 }
  0xde   :  { %v693_v17 = vpop.f32.mrf.mxu1 }
  0xdf   :  { %v690_v28 = vadd.f32 %v689_v53, %v604_v5 }
  0xe0   :  { %v611_v41 = vpop.f32.mrf.mxu0 }
  0xe1   :  { %v752_v15 = vmax.f32 %v690_v28, 0.0 }
  0xe2   :  { %v384_v45 = vpop.f32.mrf.mxu2  ;;  %v483_v25 = vpop.f32.mrf.mxu3 }
  0xe3   :  { %v385_v23 = vadd.f32 %v384_v45, %v1412_v36  ;;  %v484_v30 = vadd.f32 %v483_v25, %v380_v7  ;;  %v864_v39 = vmul.f32 %v787_v35, %v752_v15 }
  0xe5   :  { %v608_v62 = vadd.f32 %v607_v60, %v484_v30  ;;  %v881_v6 = vsel %vm880_vm2, %v864_v39, 0.0 }
  0xe6   :  { %v697_v16 = vpop.f32.mrf.mxu1 }
  0xe7   :  { %v694_v13 = vadd.f32 %v693_v17, %v608_v62 }
  0xe8   :  { %v615_v29 = vpop.f32.mrf.mxu0 }
  0xe9   :  { %v753_v22 = vmax.f32 %v694_v13, 0.0 }
  0xea   :  { %v389_v51 = vpop.f32.mrf.mxu2  ;;  %v489_v9 = vpop.f32.mrf.mxu3 }
  0xeb   :  { %v865_v38 = vmul.f32 %v792_v18, %v753_v22  ;;  %v390_v4 = vadd.f32 %v389_v51, %v1424_v59  ;;  %v490_v44 = vadd.f32 %v489_v9, %v385_v23  ;;  %v812_v18 = vpop.permute.xlu2 %811 }
  0xed   :  { %v882_v36 = vsel %vm880_vm2, %v865_v38, 0.0  ;;  %v612_v10 = vadd.f32 %v611_v41, %v490_v44 }
  0xee   :  { %v883_v21 = vadd.f32 %v882_v36, %v881_v6  ;;  %v701_v48 = vpop.f32.mrf.mxu1 }
  0xef   :  { %v698_v2 = vadd.f32 %v697_v16, %v612_v10 }
  0xf0   :  { %v619_v34 = vpop.f32.mrf.mxu0 }
  0xf1   :  { %v754_v50 = vmax.f32 %v698_v2, 0.0 }
  0xf2   :  { %v394_v56 = vpop.f32.mrf.mxu2  ;;  %v495_v58 = vpop.f32.mrf.mxu3 }
  0xf3   :  { %v866_v31 = vmul.f32 %v797_v46, %v754_v50  ;;  %v395_v42 = vadd.f32 %v394_v56, %v1436_v14  ;;  %v496_v63 = vadd.f32 %v495_v58, %v390_v4 }
  0xf5   :  { %v884_v59 = vsel %vm880_vm2, %v866_v31, 0.0  ;;  %v616_v8 = vadd.f32 %v615_v29, %v496_v63 }
  0xf6   :  { %v885_v11 = vadd.f32 %v884_v59, %v883_v21  ;;  %v705_v57 = vpop.f32.mrf.mxu1  ;;  %v817_v21 = vpop.permute.xlu0 %816 }
  0xf7   :  { %v702_v19 = vadd.f32 %v701_v48, %v616_v8  ;;  %v822_v8 = vpop.permute.xlu1 %821 }
  0xf8   :  { %v623_v40 = vpop.f32.mrf.mxu0 }
  0xf9   :  { %v755_v3 = vmax.f32 %v702_v19, 0.0 }
  0xfa   :  { %v399_v24 = vpop.f32.mrf.mxu2  ;;  %v501_v55 = vpop.f32.mrf.mxu3 }
  0xfb   :  { %v867_v53 = vmul.f32 %v802_v26, %v755_v3  ;;  %v502_v60 = vadd.f32 %v501_v55, %v395_v42  ;;  %v400_v17 = vadd.f32 %v399_v24, %v1448_v37 }
  0xfd   :  { %v886_v61 = vsel %vm880_vm2, %v867_v53, 0.0  ;;  %v620_v1 = vadd.f32 %v619_v34, %v502_v60 }
  0xfe   :  { %v887_v7 = vadd.f32 %v886_v61, %v885_v11  ;;  %v709_v14 = vpop.f32.mrf.mxu1 }
  0xff   :  { %v706_v5 = vadd.f32 %v705_v57, %v620_v1  ;;  %v827_v1 = vpop.permute.xlu2 %826 }
 0x100   :  { %v627_v35 = vpop.f32.mrf.mxu0 }
 0x101   :  { %v756_v28 = vmax.f32 %v706_v5, 0.0 }
 0x102   :  { %v404_v41 = vpop.f32.mrf.mxu2  ;;  %v507_v45 = vpop.f32.mrf.mxu3 }
 0x103   :  { %v868_v25 = vmul.f32 %v807_v27, %v756_v28  ;;  %v508_v23 = vadd.f32 %v507_v45, %v400_v17  ;;  %v405_v39 = vadd.f32 %v404_v41, %v1457_v12 }
 0x105   :  { %v888_v30 = vsel %vm880_vm2, %v868_v25, 0.0  ;;  %v624_v15 = vadd.f32 %v623_v40, %v508_v23 }
 0x106   :  { %v889_v62 = vadd.f32 %v888_v30, %v887_v7  ;;  %v713_v16 = vpop.f32.mrf.mxu1  ;;  %v832_v30 = vpop.permute.xlu0 %831 }
 0x107   :  { %v710_v13 = vadd.f32 %v709_v14, %v624_v15 }
 0x108   :  { %v631_v29 = vpop.f32.mrf.mxu0 }
 0x109   :  { %v757_v22 = vmax.f32 %v710_v13, 0.0 }
 0x10a   :  { %v409_v51 = vpop.f32.mrf.mxu2  ;;  %v513_v9 = vpop.f32.mrf.mxu3 }
 0x10b   :  { %v869_v38 = vmul.f32 %v812_v18, %v757_v22  ;;  %v514_v37 = vadd.f32 %v513_v9, %v405_v39  ;;  %v410_v48 = vadd.f32 %v409_v51, %v1465_v32 }
 0x10d   :  { %v890_v4 = vsel %vm880_vm2, %v869_v38, 0.0  ;;  %v628_v44 = vadd.f32 %v627_v35, %v514_v37 }
 0x10e   :  { %v891_v6 = vadd.f32 %v890_v4, %v889_v62  ;;  %v717_v36 = vpop.f32.mrf.mxu1  ;;  %v837_v4 = vpop.permute.xlu1 %836 }
 0x10f   :  { %v714_v10 = vadd.f32 %v713_v16, %v628_v44 }
 0x110   :  { %v635_v46 = vpop.f32.mrf.mxu0 }
 0x111   :  { %v758_v2 = vmax.f32 %v714_v10, 0.0 }
 0x112   :  { %v414_v34 = vpop.f32.mrf.mxu2  ;;  %v519_v50 = vpop.f32.mrf.mxu3 }
 0x113   :  { %v870_v56 = vmul.f32 %v817_v21, %v758_v2  ;;  %v520_v12 = vadd.f32 %v519_v50, %v410_v48  ;;  %v415_v57 = vadd.f32 %v414_v34, %v1388_v49 }
 0x115   :  { %v892_v58 = vsel %vm880_vm2, %v870_v56, 0.0  ;;  %v632_v31 = vadd.f32 %v631_v29, %v520_v12  ;;  %v842_v56 = vpop.permute.xlu2 %841 }
 0x116   :  { %v893_v42 = vadd.f32 %v892_v58, %v891_v6  ;;  %v721_v63 = vpop.f32.mrf.mxu1 }
 0x117   :  { %v718_v59 = vadd.f32 %v717_v36, %v632_v31 }
 0x118   :  { %v639_v11 = vpop.f32.mrf.mxu0 }
 0x119   :  { %v759_v19 = vmax.f32 %v718_v59, 0.0 }
 0x11a   :  { %v419_v26 = vpop.f32.mrf.mxu2  ;;  %v525_v40 = vpop.f32.mrf.mxu3 }
 0x11b   :  { %v871_v3 = vmul.f32 %v822_v8, %v759_v19  ;;  %v526_v32 = vadd.f32 %v525_v40, %v415_v57  ;;  %v420_v27 = vadd.f32 %v419_v26, %v1403_v33 }
 0x11d   :  { %v894_v24 = vsel %vm880_vm2, %v871_v3, 0.0  ;;  %v636_v55 = vadd.f32 %v635_v46, %v526_v32  ;;  %v847_v32 = vpop.permute.xlu0 %846 }
 0x11e   :  { %v895_v53 = vadd.f32 %v894_v24, %v893_v42  ;;  %v725_v60 = vpop.f32.mrf.mxu1 }
 0x11f   :  { %v722_v61 = vadd.f32 %v721_v63, %v636_v55 }
 0x120   :  { %v643_v7 = vpop.f32.mrf.mxu0 }
 0x121   :  { %v760_v14 = vmax.f32 %v722_v61, 0.0 }
 0x122   :  { %v424_v5 = vpop.f32.mrf.mxu2  ;;  %v531_v35 = vpop.f32.mrf.mxu3 }
 0x123   :  { %v872_v17 = vmul.f32 %v827_v1, %v760_v14  ;;  %v532_v49 = vadd.f32 %v531_v35, %v420_v27  ;;  %v425_v15 = vadd.f32 %v424_v5, %v1418_v20  ;;  %v852_v14 = vpop.permute.xlu1 %851 }
 0x125   :  { %v896_v28 = vsel %vm880_vm2, %v872_v17, 0.0  ;;  %v640_v41 = vadd.f32 %v639_v11, %v532_v49 }
 0x126   :  { %v897_v45 = vadd.f32 %v896_v28, %v895_v53  ;;  %v729_v25 = vpop.f32.mrf.mxu1 }
 0x127   :  { %v726_v23 = vadd.f32 %v725_v60, %v640_v41 }
 0x128   :  { %v647_v16 = vpop.f32.mrf.mxu0 }
 0x129   :  { %v761_v62 = vmax.f32 %v726_v23, 0.0 }
 0x12a   :  { %v429_v13 = vpop.f32.mrf.mxu2  ;;  %v537_v18 = vpop.f32.mrf.mxu3 }
 0x12b   :  { %v873_v29 = vmul.f32 %v832_v30, %v761_v62  ;;  %v538_v33 = vadd.f32 %v537_v18, %v425_v15  ;;  %v430_v37 = vadd.f32 %v429_v13, %v1427_v52  ;;  %v857_v15 = vpop.permute.xlu2 %856 }
 0x12d   :  { %v898_v39 = vsel %vm880_vm2, %v873_v29, 0.0  ;;  %v644_v22 = vadd.f32 %v643_v7, %v538_v33 }
 0x12e   :  { %v899_v51 = vadd.f32 %v898_v39, %v897_v45  ;;  %v733_v9 = vpop.f32.mrf.mxu1 }
 0x12f   :  { %v730_v38 = vadd.f32 %v729_v25, %v644_v22 }
 0x130   :  { %v651_v21 = vpop.f32.mrf.mxu0 }
 0x131   :  { %v762_v44 = vmax.f32 %v730_v38, 0.0 }
 0x132   :  { %v434_v6 = vpop.f32.mrf.mxu2  ;;  %v543_v36 = vpop.f32.mrf.mxu3 }
 0x133   :  { %v874_v10 = vmul.f32 %v837_v4, %v762_v44  ;;  %v544_v20 = vadd.f32 %v543_v36, %v430_v37  ;;  %v435_v12 = vadd.f32 %v434_v6, %v1439_v54  ;;  %v862_v37 = vpop.permute.xlu0 %861 }
 0x135   :  { %v900_v46 = vsel %vm880_vm2, %v874_v10, 0.0  ;;  %v648_v48 = vadd.f32 %v647_v16, %v544_v20 }
 0x136   :  { %v901_v2 = vadd.f32 %v900_v46, %v899_v51  ;;  %v737_v34 = vpop.f32.mrf.mxu1 }
 0x137   :  { %v734_v50 = vadd.f32 %v733_v9, %v648_v48 }
 0x138   :  { %v655_v57 = vpop.f32.mrf.mxu0 }
 0x139   :  { %v763_v58 = vmax.f32 %v734_v50, 0.0 }
 0x13a   :  { %v439_v31 = vpop.f32.mrf.mxu2  ;;  %v549_v42 = vpop.f32.mrf.mxu3 }
 0x13b   :  { %v875_v52 = vmul.f32 %v842_v56, %v763_v58  ;;  %v550_v63 = vadd.f32 %v549_v42, %v435_v12  ;;  %v440_v40 = vadd.f32 %v439_v31, %v1451_v0 }
 0x13d   :  { %v902_v59 = vsel %vm880_vm2, %v875_v52, 0.0  ;;  %v652_v8 = vadd.f32 %v651_v21, %v550_v63 }
 0x13e   :  { %v903_v11 = vadd.f32 %v902_v59, %v901_v2  ;;  %v741_v26 = vpop.f32.mrf.mxu1 }
 0x13f   :  { %v738_v19 = vadd.f32 %v737_v34, %v652_v8 }
 0x140   :  { %v659_v27 = vpop.f32.mrf.mxu0 }
 0x141   :  { %v764_v3 = vmax.f32 %v738_v19, 0.0 }
 0x142   :  { %v555_v24 = vpop.f32.mrf.mxu3  ;;  %v444_v54 = vpop.f32.mrf.mxu2 }
 0x143   :  { %v876_v55 = vmul.f32 %v847_v32, %v764_v3  ;;  %v556_v53 = vadd.f32 %v555_v24, %v440_v40  ;;  %v445_v5 = vadd.f32 %v444_v54, %v1460_v43 }
 0x145   :  { %v904_v60 = vsel %vm880_vm2, %v876_v55, 0.0  ;;  %v656_v61 = vadd.f32 %v655_v57, %v556_v53 }
 0x146   :  { %v905_v1 = vadd.f32 %v904_v60, %v903_v11  ;;  %v745_v49 = vpop.f32.mrf.mxu1 }
 0x147   :  { %v742_v7 = vadd.f32 %v741_v26, %v656_v61 }
 0x148   :  { %v663_v18 = vpop.f32.mrf.mxu0 }
 0x149   :  { %v765_v35 = vmax.f32 %v742_v7, 0.0 }
 0x14a   :  { %v561_v17 = vpop.f32.mrf.mxu3  ;;  %v449_v23 = vpop.f32.mrf.mxu2 }
 0x14b   :  { %v877_v28 = vmul.f32 %v852_v14, %v765_v35  ;;  %v562_v0 = vadd.f32 %v561_v17, %v445_v5  ;;  %v450_v62 = vadd.f32 %v449_v23, %v1468_v47 }
 0x14d   :  { %v906_v41 = vsel %vm880_vm2, %v877_v28, 0.0  ;;  %v660_v45 = vadd.f32 %v659_v27, %v562_v0 }
 0x14e   :  { %v907_v25 = vadd.f32 %v906_v41, %v905_v1  ;;  %v749_v43 = vpop.f32.mrf.mxu1 }
 0x14f   :  { %v746_v30 = vadd.f32 %v745_v49, %v660_v45 }
 0x151   :  { %v766_v16 = vmax.f32 %v746_v30, 0.0 }
 0x152   :  { %v567_v13 = vpop.f32.mrf.mxu3 }
 0x153   :  { %v878_v29 = vmul.f32 %v857_v15, %v766_v16  ;;  %v568_v33 = vadd.f32 %v567_v13, %v450_v62 }
 0x155   :  { %v908_v39 = vsel %vm880_vm2, %v878_v29, 0.0  ;;  %v664_v22 = vadd.f32 %v663_v18, %v568_v33 }
 0x156   :  { %v909_v51 = vadd.f32 %v908_v39, %v907_v25 }
 0x157   :  { %v750_v9 = vadd.f32 %v749_v43, %v664_v22 }
 0x159   :  { %v767_v38 = vmax.f32 %v750_v9, 0.0 }
 0x15b   :  { %v879_v4 = vmul.f32 %v862_v37, %v767_v38 }
 0x15d   :  { %v910_v44 = vsel %vm880_vm2, %v879_v4, 0.0 }
 0x15e   :  { %v911_v6 = vadd.f32 %v910_v44, %v909_v51 }
 0x160   :  { %v912_v36 = vrot.slane %v911_v6, 4 }
 0x162   :  { %v913_v10 = vadd.f32 %v912_v36, %v911_v6 }
 0x164   :  { %v914_v47 = vrot.slane %v913_v10, 2 }
 0x166   :  { %v915_v20 = vadd.f32 %v914_v47, %v913_v10 }
 0x168   :  { %v916_v21 = vrot.slane %v915_v20, 1 }
 0x16a   :  { %v917_v46 = vadd.f32 %v916_v21, %v915_v20 }
 0x16c   :  { %919 = vst.msk [vmem:[#allocation2] sm:$0x1] %vm918_vm3, %v917_v46 }
 0x16d   :  { %930 = dma.vmem_to_hbm [thread:$0]  %s926_s0, 16, %s928_s30, [#allocation3]  }
 0x16e   :  { %975 = dma.done.wait [#allocation3], 16  }
 0x16f   :  { %976 = vsyncadd [#allocation3], 4294967280 }
 0x170   :  { %935 = vsyncpa [#allocation3], 1 }

</bundles_post_ra>
